<compile_context>
chip_gen: v7x
topology: tpu7x:2x2x1
jax: 0.10.0
libtpu: 0.0.40
codegen_flags: <defaults>
</compile_context>

<pallas_src>
import jax
import jax.numpy as jnp
from jax.experimental import pallas as pl
from jax.experimental.pallas import tpu as pltpu


def _conv_mxu_kernel(x_lo_ref, x_hi_ref, t_lo_ref, t_hi_ref, out_ref):
    """One 128-lane output tile of the full convolution via two MXU matmuls.

    x_lo_ref: (B, 128)   input window covering lanes [n0,     n0+128)
    x_hi_ref: (B, 128)   input window covering lanes [n0+128, n0+256)
    t_lo_ref/t_hi_ref: (128, 128) fixed banded (flipped-delta) matrices.
    """
    acc = jnp.dot(x_lo_ref[...], t_lo_ref[...],
                  preferred_element_type=jnp.float32)
    acc = acc + jnp.dot(x_hi_ref[...], t_hi_ref[...],
                        preferred_element_type=jnp.float32)
    out_ref[...] = acc.astype(out_ref.dtype)


def _banded_delta_matrices(delta, tile_n, xs_dtype):
    """Build T[w, t] = delta[M-1-(w-t)] for 0 <= w-t < M, else 0 (shape 2T x T)."""
    (M,) = delta.shape
    w = jnp.arange(2 * tile_n)[:, None]
    t = jnp.arange(tile_n)[None, :]
    d = w - t
    band = (d >= 0) & (d < M)
    t_full = jnp.where(band, delta[jnp.clip(M - 1 - d, 0, M - 1)],
                       jnp.zeros((), delta.dtype)).astype(xs_dtype)
    return t_full[:tile_n], t_full[tile_n:]


def triplet_optimizer_forward(xs, delta, *, tile_n=128):
    """Pallas equivalent of TripletOptimizer(delta).forward() with global Xs=xs."""
    B, N = xs.shape
    (M,) = delta.shape
    assert M <= tile_n + 1, "delta longer than tile_n + 1 not supported yet"

    n_out = N + M - 1
    num_tiles = pl.cdiv(n_out, tile_n)          # 128-lane output tiles
    # Padded input: (M-1) left halo + right padding so every grid step can read
    # two adjacent, lane-aligned 128-wide windows.
    xpad_len = (num_tiles + 1) * tile_n
    xpad = jnp.pad(xs, ((0, 0), (M - 1, xpad_len - (M - 1) - N)))

    # y[b, n0+t] = sum_w xpad[b, n0+w] * T[w, t]   (w in [0, 2*tile_n))
    t_lo, t_hi = _banded_delta_matrices(delta, tile_n, xs.dtype)

    out_padded = pl.pallas_call(
        _conv_mxu_kernel,
        out_shape=jax.ShapeDtypeStruct((B, num_tiles * tile_n), xs.dtype),
        grid=(num_tiles,),
        in_specs=[
            pl.BlockSpec((B, tile_n), lambda i: (0, i)),        # window lo
            pl.BlockSpec((B, tile_n), lambda i: (0, i + 1)),    # window hi
            pl.BlockSpec((tile_n, tile_n), lambda i: (0, 0)),   # T_lo (resident)
            pl.BlockSpec((tile_n, tile_n), lambda i: (0, 0)),   # T_hi (resident)
        ],
        out_specs=pl.BlockSpec((B, tile_n), lambda i: (0, i)),  # lane-dense out
        compiler_params=pltpu.CompilerParams(
            dimension_semantics=("parallel",)),
    )(xpad, xpad, t_lo, t_hi)

    # Slice the lane padding back off (e.g. 143 valid lanes of 256).
    return out_padded[:, :n_out]


if __name__ == "__main__":
    key = jax.random.PRNGKey(0)
    k_x, k_d = jax.random.split(key)

    B, N, M = 2, 128, 16          # small shapes: batch=2, signal length=128, delta taps=16
    Xs = jax.random.normal(k_x, (B, N), dtype=jnp.float32)
    delta = jax.random.normal(k_d, (M,), dtype=jnp.float32)  # deterministic "learned" delta

    fwd = jax.jit(triplet_optimizer_forward)
    out = jax.block_until_ready(fwd(Xs, delta))

    # Reference: full convolution per batch row (matches torchaudio.functional.convolve).
    ref = jax.vmap(lambda x: jnp.convolve(x, delta, mode="full"))(Xs)
    assert out.shape == (B, N + M - 1)
    # Tolerance accounts for MXU f32 matmul rounding vs. the XLA conv reference;
    # logic/indexing bugs would show up as O(1) discrepancies, well above this.
    assert jnp.allclose(out, ref, atol=1e-2, rtol=1e-2)

    print("KERNEL_OK")
</pallas_src>

<mosaic_0001>
module attributes {stable_mosaic.version = 11 : i64} {
  func.func @_conv_mxu_kernel(%arg0: i32, %arg1: memref<2x128xf32, #tpu.memory_space<vmem>>, %arg2: memref<2x128xf32, #tpu.memory_space<vmem>>, %arg3: memref<128x128xf32, #tpu.memory_space<vmem>>, %arg4: memref<128x128xf32, #tpu.memory_space<vmem>>, %arg5: memref<2x128xf32, #tpu.memory_space<vmem>>) attributes {dimension_semantics = [#tpu.dimension_semantics<parallel>], iteration_bounds = array<i64: 2>, scalar_prefetch = 0 : i64, scratch_operands = 0 : i64, tpu.core_type = #tpu.core_type<tc>, window_params = [{transform_indices = @transform_0, window_bounds = array<i64: 2, 128>}, {transform_indices = @transform_1, window_bounds = array<i64: 2, 128>}, {pipeline_mode = #tpu.pipeline_mode<synchronous>, transform_indices = @transform_2, window_bounds = array<i64: 128, 128>}, {pipeline_mode = #tpu.pipeline_mode<synchronous>, transform_indices = @transform_3, window_bounds = array<i64: 128, 128>}, {transform_indices = @transform_4, window_bounds = array<i64: 2, 128>}]} {
    %c0 = arith.constant 0 : index
    %c0_0 = arith.constant 0 : index
    %0 = vector.load %arg1[%c0, %c0_0] : memref<2x128xf32, #tpu.memory_space<vmem>>, vector<2x128xf32>
    %c0_1 = arith.constant 0 : index
    %c0_2 = arith.constant 0 : index
    %1 = vector.load %arg3[%c0_1, %c0_2] : memref<128x128xf32, #tpu.memory_space<vmem>>, vector<128x128xf32>
    %cst = arith.constant dense<0.000000e+00> : vector<2x128xf32>
    %2 = tpu.matmul %0, %1, %cst {dimension_numbers = #tpu.dot_dimension_numbers<[1], [0], [0], [1], [0, 0, 1, 1], [], []>} : vector<2x128xf32>, vector<128x128xf32>, vector<2x128xf32> -> vector<2x128xf32>
    %c0_3 = arith.constant 0 : index
    %c0_4 = arith.constant 0 : index
    %3 = vector.load %arg2[%c0_3, %c0_4] : memref<2x128xf32, #tpu.memory_space<vmem>>, vector<2x128xf32>
    %c0_5 = arith.constant 0 : index
    %c0_6 = arith.constant 0 : index
    %4 = vector.load %arg4[%c0_5, %c0_6] : memref<128x128xf32, #tpu.memory_space<vmem>>, vector<128x128xf32>
    %cst_7 = arith.constant dense<0.000000e+00> : vector<2x128xf32>
    %5 = tpu.matmul %3, %4, %cst_7 {dimension_numbers = #tpu.dot_dimension_numbers<[1], [0], [0], [1], [0, 0, 1, 1], [], []>} : vector<2x128xf32>, vector<128x128xf32>, vector<2x128xf32> -> vector<2x128xf32>
    %6 = arith.addf %2, %5 : vector<2x128xf32>
    %c0_8 = arith.constant 0 : index
    %c0_9 = arith.constant 0 : index
    %7 = vector.load %arg5[%c0_8, %c0_9] : memref<2x128xf32, #tpu.memory_space<vmem>>, vector<2x128xf32>
    tpu.vector_store %arg5[%c0_8, %c0_9], %6 {strides = array<i32>} : memref<2x128xf32, #tpu.memory_space<vmem>>, vector<2x128xf32>,
    return
  }
  func.func @transform_0(%arg0: i32) -> (i32, i32) {
    %c0_i32 = arith.constant 0 : i32
    %c0_i32_0 = arith.constant 0 : i32
    return %c0_i32, %arg0 : i32, i32
  }
  func.func @transform_1(%arg0: i32) -> (i32, i32) {
    %c1_i32 = arith.constant 1 : i32
    %0 = arith.addi %arg0, %c1_i32 : i32
    %c0_i32 = arith.constant 0 : i32
    %c0_i32_0 = arith.constant 0 : i32
    return %c0_i32, %0 : i32, i32
  }
  func.func @transform_2(%arg0: i32) -> (i32, i32) {
    %c0_i32 = arith.constant 0 : i32
    %c0_i32_0 = arith.constant 0 : i32
    %c0_i32_1 = arith.constant 0 : i32
    return %c0_i32, %c0_i32_0 : i32, i32
  }
  func.func @transform_3(%arg0: i32) -> (i32, i32) {
    %c0_i32 = arith.constant 0 : i32
    %c0_i32_0 = arith.constant 0 : i32
    %c0_i32_1 = arith.constant 0 : i32
    return %c0_i32, %c0_i32_0 : i32, i32
  }
  func.func @transform_4(%arg0: i32) -> (i32, i32) {
    %c0_i32 = arith.constant 0 : i32
    %c0_i32_0 = arith.constant 0 : i32
    return %c0_i32, %arg0 : i32, i32
  }
}

</mosaic_0001>

<bundles_post_ra>
// kernel: triplet_optimizer_forward.1
= control target key start
LH: loop header
LB: loop body
LE: loop exit
PB: predicated region body
PF: predicated region fallthrough
CT: control target
= control target key end

     0   :  { %9 = vsyncpa [#allocation3], 0  ;;  %s992_s0 = inlined_call_operand.vmem [shape: f32[2,384], index: 0, kind: input, shape index: {}, may-alias: {0,1}]   ;;  %s993_s1 = inlined_call_operand.vmem [shape: f32[2,384], index: 1, kind: input, shape index: {}, may-alias: {0,1}]   ;;  %s994_s2 = inlined_call_operand.vmem [shape: f32[128,128], index: 2, kind: input, shape index: {}]   ;;  %s995_s3 = inlined_call_operand.vmem [shape: f32[128,128], index: 3, kind: input, shape index: {}]   ;;  %s996_s4 = inlined_call_operand.hbm [shape: f32[2,256], index: 4, kind: output, shape index: {}]  }
   0x1   :  { %11 = vsyncpa [#allocation3 + $0x1], 0  ;;  %s776_s15 = smov 0   ;;  %s778_s16 = smov 0  }
   0x2   :  { %s780_s17 = smov 0   ;;  %s782_s18 = smov 0  }
   0x3 LB: > { %s797_s19 = sadd.s32 4294967295, %s745_s18   ;;  %s477_s20 = sadd.s32 4294967294, %s745_s18   ;;  %s745_s18 = sphi %s782_s18, %s1002_s18   ;;  %s741_s17 = sphi %s780_s17, %s1001_s17   ;;  %s737_s16 = sphi %s778_s16, %s1000_s16   ;;  %s733_s15 = sphi %s776_s15, %s999_s15  }
   0x4   : > { %s801_s21 = sadd.s32 1, %s745_s18   ;;  %s120_s22 = sadd.s32 1, %s741_s17 }
   0x5   : > { %s117_s23 = ssub.s32 %s745_s18, %s801_s21  ;;  %p130_p0 = scmp.ne.s32.totalorder %s741_s17, %s737_s16 }
   0x6   : > { %p118_p1 = scmp.eq.s32.totalorder %s117_s23, 0  ;;  %p131_p2 = scmp.eq.s32.totalorder %s797_s19, 1 }
   0x7   : > { %p136_p3 = scmp.ne.s32.totalorder %s737_s16, %s733_s15  ;;  %p137_p4 = scmp.eq.s32.totalorder %s477_s20, 1 }
   0x8   : > { %s812_s24 = scalar_select %p118_p1, %s741_s17, %s120_s22  }
   0x9   : > { %p814_p5 = por %p131_p2, %p130_p0  ;;  %p818_p6 = por %p137_p4, %p136_p3 }
   0xa   : > { %p480_p7 = scmp.ge.s32.totalorder %s745_s18, 1  ;;  %p177_p8 = scmp.lt.s32.totalorder %s745_s18, 3 }
   0xc   : > { %p178_p9 = pnand %p480_p7, %p177_p8 }
   0xd   : > { %v235_v0 = vld [vmem:[%s995_s3] sm:$0xff] (!%p178_p9)  ;;  %v236_v1 = vld [vmem:[%s995_s3 + $0x8] sm:$0xff] (!%p178_p9)  ;;  %v747_v3 = vmov (!%p178_p9), 0.0|0.0   ;;  %v237_v6 = vld [vmem:[%s995_s3 + $0x10] sm:$0xff] (!%p178_p9)  ;;  %vm748_vm0 = vmmov (!%p178_p9), 0   ;;  %v749_v11 = vmov (!%p178_p9), 0.0  }
   0xe   : > { %181 = sbr.rel (%p178_p9) target bundleno = 276 (0x114), region = 36  ;;  %v218_v2 = vld [vmem:[%s994_s2] sm:$0xff] (!%p178_p9)  ;;  %592 = vmatprep.subr.bf16.mxu1 (!%p178_p9), %v747_v3  ;;  %616 = vmatprep.subr.bf16.mxu0 (!%p178_p9), %v747_v3  ;;  %v593_v4 = vpack.c.bf16 (!%p178_p9), %v236_v1, %v235_v0  ;;  %v219_v5 = vld [vmem:[%s994_s2 + $0x8] sm:$0xff] (!%p178_p9)  ;;  %v238_v7 = vld [vmem:[%s995_s3 + $0x18] sm:$0xff] (!%p178_p9)  ;;  %s211_s7 = sadd.s32 (!%p178_p9), 1, %s797_s19 }
   0xf   : > { %v617_v8 = vpack.c.bf16 (!%p178_p9), %v219_v5, %v218_v2  ;;  %v220_v9 = vld [vmem:[%s994_s2 + $0x10] sm:$0xff] (!%p178_p9)  ;;  %v221_v10 = vld [vmem:[%s994_s2 + $0x18] sm:$0xff] (!%p178_p9)  ;;  %554 = vmatprep.mubr.msk.f32.mxu1 (!%p178_p9), %vm748_vm0, %v749_v11  ;;  %589 = vmatprep.mubr.msk.f32.mxu0 (!%p178_p9), %vm748_vm0, %v749_v11  ;;  %v596_v12 = vpack.c.bf16 (!%p178_p9), %v238_v7, %v237_v6  ;;  %v239_v14 = vld [vmem:[%s995_s3 + $0x20] sm:$0xff] (!%p178_p9)  ;;  %p212_p10 = scmp.lt.s32.totalorder (!%p178_p9), %s211_s7, 2  ;;  %p207_p11 = scmp.lt.s32.totalorder (!%p178_p9), %s797_s19, 2 }
  0x10   : > { %594 = vmatpush3.bf16.msra.mxu1 (!%p178_p9), %v593_v4  ;;  %v620_v13 = vpack.c.bf16 (!%p178_p9), %v221_v10, %v220_v9  ;;  %v240_v15 = vld [vmem:[%s995_s3 + $0x28] sm:$0xff] (!%p178_p9)  ;;  %v222_v16 = vld [vmem:[%s994_s2 + $0x20] sm:$0xff] (!%p178_p9)  ;;  %v241_v20 = vld [vmem:[%s995_s3 + $0x30] sm:$0xff] (!%p178_p9)  ;;  %s485_s10 = sshll.u32 (!%p178_p9), %s797_s19, 5 }
  0x11   : > { %618 = vmatpush3.bf16.msra.mxu0 (!%p178_p9), %v617_v8  ;;  %595 = vmatprep.subr.bf16.mxu1 (!%p178_p9), %v747_v3  ;;  %v223_v17 = vld [vmem:[%s994_s2 + $0x28] sm:$0xff] (!%p178_p9)  ;;  %v599_v18 = vpack.c.bf16 (!%p178_p9), %v240_v15, %v239_v14  ;;  %v242_v21 = vld [vmem:[%s995_s3 + $0x38] sm:$0xff] (!%p178_p9)  ;;  %v224_v22 = vld [vmem:[%s994_s2 + $0x30] sm:$0xff] (!%p178_p9)  ;;  %s950_s20 = scalar_lea.hbm (!%p178_p9), %s996_s4, %s485_s10 }
  0x12   : > { %619 = vmatprep.subr.bf16.mxu0 (!%p178_p9), %v747_v3  ;;  %v623_v19 = vpack.c.bf16 (!%p178_p9), %v223_v17, %v222_v16  ;;  %v225_v23 = vld [vmem:[%s994_s2 + $0x38] sm:$0xff] (!%p178_p9)  ;;  %v602_v24 = vpack.c.bf16 (!%p178_p9), %v242_v21, %v241_v20  ;;  %v243_v26 = vld [vmem:[%s995_s3 + $0x40] sm:$0xff] (!%p178_p9)  ;;  %v244_v27 = vld [vmem:[%s995_s3 + $0x48] sm:$0xff] (!%p178_p9) }
  0x13   : > { %v626_v25 = vpack.c.bf16 (!%p178_p9), %v225_v23, %v224_v22  ;;  %v226_v28 = vld [vmem:[%s994_s2 + $0x40] sm:$0xff] (!%p178_p9)  ;;  %v227_v29 = vld [vmem:[%s994_s2 + $0x48] sm:$0xff] (!%p178_p9)  ;;  %v605_v30 = vpack.c.bf16 (!%p178_p9), %v244_v27, %v243_v26  ;;  %v245_v32 = vld [vmem:[%s995_s3 + $0x50] sm:$0xff] (!%p178_p9) }
  0x14   : > { %597 = vmatpush3.bf16.msra.mxu1 (!%p178_p9), %v596_v12  ;;  %v629_v31 = vpack.c.bf16 (!%p178_p9), %v227_v29, %v226_v28  ;;  %v246_v33 = vld [vmem:[%s995_s3 + $0x58] sm:$0xff] (!%p178_p9)  ;;  %v228_v34 = vld [vmem:[%s994_s2 + $0x50] sm:$0xff] (!%p178_p9)  ;;  %v247_v38 = vld [vmem:[%s995_s3 + $0x60] sm:$0xff] (!%p178_p9) }
  0x15   : > { %621 = vmatpush3.bf16.msra.mxu0 %v620_v13  ;;  %598 = vmatprep.subr.bf16.mxu1 %v747_v3  ;;  %v229_v35 = vld [vmem:[%s994_s2 + $0x58] sm:$0xff]  ;;  %v608_v36 = vpack.c.bf16 %v246_v33, %v245_v32  ;;  %v248_v39 = vld [vmem:[%s995_s3 + $0x68] sm:$0xff]  ;;  %v230_v40 = vld [vmem:[%s994_s2 + $0x60] sm:$0xff]  ;;  %s1004_s7 = smov (!%p212_p10, %s211_s7), 2 }
  0x16   : > { %622 = vmatprep.subr.bf16.mxu0 %v747_v3  ;;  %v632_v37 = vpack.c.bf16 %v229_v35, %v228_v34  ;;  %v231_v41 = vld [vmem:[%s994_s2 + $0x68] sm:$0xff]  ;;  %s208_s8 = scalar_select %p207_p11, %s797_s19, 2  ;;  %v611_v42 = vpack.c.bf16 %v248_v39, %v247_v38  ;;  %v249_v44 = vld [vmem:[%s995_s3 + $0x70] sm:$0xff]  ;;  %v250_v45 = vld [vmem:[%s995_s3 + $0x78] sm:$0xff] }
  0x17   : > { %v635_v43 = vpack.c.bf16 %v231_v41, %v230_v40  ;;  %v232_v46 = vld [vmem:[%s994_s2 + $0x70] sm:$0xff]  ;;  %v233_v47 = vld [vmem:[%s994_s2 + $0x78] sm:$0xff]  ;;  %s483_s23 = sshll.u32 %s1004_s7, 1  ;;  %v614_v48 = vpack.c.bf16 %v250_v45, %v249_v44  ;;  %s204_s7 = sand.u32 1, %s737_s16  }
  0x18   : > { %600 = vmatpush3.bf16.msra.mxu1 %v599_v18  ;;  %s482_s27 = sshll.u32 %s208_s8, 1  ;;  %v638_v49 = vpack.c.bf16 %v233_v47, %v232_v46  ;;  %s215_s30 = scalar_lea.vmem %s993_s1, %s483_s23 }
  0x19   : > { %624 = vmatpush3.bf16.msra.mxu0 %v623_v19  ;;  %601 = vmatprep.subr.bf16.mxu1 %v747_v3  ;;  %s210_s9 = scalar_lea.vmem %s992_s0, %s482_s27  ;;  %v234_v50 = vld [vmem:[%s215_s30] sm:$0x3]  ;;  %s481_s8 = sshll.u32 %s204_s7, 1 }
  0x1a   : > { %625 = vmatprep.subr.bf16.mxu0 %v747_v3  ;;  %v217_v51 = vld [vmem:[%s210_s9] sm:$0x3]  ;;  %s206_s11 = scalar_lea.vmem [#allocation2], %s481_s8  ;;  %s393_s22 = scalar_lea.sflag [#allocation3], %s204_s7 }
  0x1b   : > { %s406_s12 = sshll.u32 %s206_s11, 4  ;;  %s750_s23 = smov [#allocation2]   ;;  %s952_s12 = int_to_ptr.vmem [resolvable:$true] %s406_s12 }
  0x1c   : > { %603 = vmatpush3.bf16.msra.mxu1 %v602_v24  ;;  %s683_s19 = scalar_lea.vmem %s952_s12, 32  ;;  %s687_s27 = sshll.u32 %s750_s23, 4  ;;  %s688_s27 = int_to_ptr.vmem [resolvable:$false] %s687_s27 }
  0x1d   : > { %627 = vmatpush3.bf16.msra.mxu0 %v626_v25  ;;  %604 = vmatprep.subr.bf16.mxu1 %v747_v3  ;;  %p684_p12 = scmp.ne.s32.totalorder %s952_s12, %s683_s19  ;;  %s689_s28 = scalar_lea.vmem %s688_s27, 64 }
  0x1e   : > { %628 = vmatprep.subr.bf16.mxu0 %v747_v3  ;;  %p690_p1 = scmp.lt.s32.totalorder %s952_s12, %s688_s27  ;;  %p691_p2 = scmp.lt.s32.totalorder %s689_s28, %s683_s19 }
  0x1f   : > { %p685_p13 = pnand %p684_p12, %p814_p5 }
  0x20   : > { %606 = vmatpush3.bf16.msra.mxu1 %v605_v30  ;;  %p692_p3 = por %p691_p2, %p690_p1 }
  0x21   : > { %630 = vmatpush3.bf16.msra.mxu0 %v629_v31  ;;  %607 = vmatprep.subr.bf16.mxu1 %v747_v3  ;;  %p686_p0 = pneg %p685_p13 }
  0x22   : > { %631 = vmatprep.subr.bf16.mxu0 %v747_v3 }
  0x23   : > { %p693_p4 = pnand %p692_p3, %p686_p0 }
  0x24   : > { %609 = vmatpush3.bf16.msra.mxu1 %v608_v36 }
  0x25   : > { %633 = vmatpush3.bf16.msra.mxu0 %v632_v37  ;;  %610 = vmatprep.subr.bf16.mxu1 %v747_v3 }
  0x26   : > { %634 = vmatprep.subr.bf16.mxu0 %v747_v3 }
  0x28   : > { %612 = vmatpush3.bf16.msra.mxu1 %v611_v42 }
  0x29   : > { %636 = vmatpush3.bf16.msra.mxu0 %v635_v43  ;;  %613 = vmatprep.subr.bf16.mxu1 %v747_v3 }
  0x2a   : > { %637 = vmatprep.subr.bf16.mxu0 %v747_v3 }
  0x2c   : > { %615 = vmatpush3.bf16.msra.mxu1 %v614_v48 }
  0x2d   : > { %639 = vmatpush3.bf16.msra.mxu0 %v638_v49 }
  0x2f   : > { %555 = vmatmul.mubr.f32.vlgmr.msra.gmra.mrb[0].mxu1 %v234_v50 }
  0x30   : > { %590 = vmatmul.mubr.f32.vlgmr.msra.gmra.mrb[0].mxu0 %v217_v51 }
 0x102   : > { %v317_v52 = vpop.f32.mrb[0].mxu1 }
 0x103   : > { %v387_v53 = vpop.f32.mrb[0].mxu0  ;;  %v556_v54 = vpop.f32.mrb[1].mxu1 }
 0x104   : > { %v388_v55 = vadd.f32 %v387_v53, %v317_v52  ;;  %v591_v56 = vpop.f32.mrb[1].mxu0 }
 0x106   : > { %391 = vst [vmem:[%s206_s11] sm:$0x3] %v388_v55 }
 0x107   : > { %696 = shalt.err (!%p693_p4)
}
 0x108   : > { %s697_s29 = scalar_lea.hbm %s950_s20, 32  ;;  %s701_s6 = scalar_lea.hbm %s996_s4, 64 }
 0x109   : > { %p698_p7 = scmp.ne.s32.totalorder %s950_s20, %s697_s29  ;;  %p702_p10 = scmp.lt.u32.totalorder %s950_s20, %s996_s4 }
 0x10a   : > { %p703_p11 = scmp.lt.u32.totalorder %s701_s6, %s697_s29  ;;  %p705_p13 = scmp.lt.u32.totalorder %s697_s29, %s950_s20 }
 0x10b   : > { %p699_p8 = pnand %p698_p7, %p814_p5 }
 0x10c   : > { %p704_p12 = por %p703_p11, %p702_p10 }
 0x10d   : > { %p700_p9 = pneg %p699_p8 }
 0x10e   : > { %p706_p0 = por %p705_p13, %p704_p12 }
 0x110   : > { %p707_p1 = pnand %p706_p0, %p700_p9 }
 0x112   : > { %710 = shalt.err (!%p707_p1)
}
 0x113   : > { %641 = dma.vmem_to_hbm [thread:$0]  (%p814_p5), %s952_s12, 32, %s950_s20, %s393_s22  }
 0x114 PF: > { %p647_p2 = scmp.ge.s32.totalorder %s745_s18, 2  ;;  %s418_s8 = sand.u32 1, %s733_s15  }
 0x115   : > { %s419_s10 = scalar_lea.sflag [#allocation3], %s418_s8 }
 0x116   : > { %p644_p3 = pnand %p647_p2, %p818_p6 }
 0x118   : > { %728 = dma.done.wait (!%p644_p3), %s419_s10, 32  }
 0x119   : > { %730 = vsyncadd (!%p644_p3), %s419_s10, 4294967264  ;;  %p14_p4 = scmp.ge.s32.totalorder %s801_s21, 4   ;;  %s999_s15 = smov %s737_s16 }
 0x11a   : > { %s1000_s16 = smov %s741_s17  ;;  %s1001_s17 = smov %s812_s24 }
 0x11b   : > { %s1002_s18 = smov %s801_s21  ;;  %16 = sbr.rel (!%p14_p4) target bundleno = 3 (0x3), region = 74 }
 0x122   :  { %424 = vsyncpa [#allocation3], 1 }
 0x123   :  { %426 = vsyncpa [#allocation3 + $0x1], 1 }

</bundles_post_ra>
